<compile_context>
chip_gen: v7x
topology: tpu7x:2x2x1
jax: 0.10.0
libtpu: 0.0.40
codegen_flags: <defaults>
</compile_context>

<pallas_src>
import functools

import jax
import jax.numpy as jnp
from jax.experimental import pallas as pl
from jax.experimental.pallas import tpu as pltpu

NEG_INF = -1e30
LANE = 128


def _round_up(x, m):
    return (x + m - 1) // m * m


def _vmem_capacity_bytes():
    """Physical per-core VMEM (64 MiB on v7x, 128 MiB on v5e/v6e)."""
    try:
        return int(pltpu.get_tpu_info().vmem_capacity_bytes)
    except Exception:
        return 64 * 1024 * 1024  # conservative default (v7x)


def _pick_row_tile(n, bytes_per_row, budget_bytes, *, min_tile=32, min_grid_steps=1):
    """Largest row tile that divides `n` and fits the VMEM budget.

    Pass 1 additionally honors a minimum tile (int8 adjacency packs 32 rows per
    sublane group) and keeps at least `min_grid_steps` grid steps so per-block DMAs
    overlap compute and megacore partitioning has work for both TensorCores.
    The awkward-`n` fallback never exceeds the budget (raises instead of silently
    picking a full-N block that blows VMEM).
    """
    candidates = (1024, 512, 256, 128, 64, 32, 16, 8)

    def fits(t):
        return n % t == 0 and t * bytes_per_row <= budget_bytes

    for t in candidates:
        if t >= min_tile and n // t >= min_grid_steps and fits(t):
            return t
    for t in candidates:                       # drop the soft constraints
        if fits(t):
            return t
    t_max = int(min(n, max(budget_bytes // max(bytes_per_row, 1), 1)))
    for t in range(t_max, 0, -1):              # awkward n: any divisor inside budget
        if n % t == 0:
            return t
    raise ValueError(
        f"no row tile of {n} rows fits the VMEM budget "
        f"({budget_bytes} bytes at {bytes_per_row} bytes/row)")


def _resident_spec(block_shape, index_map, single_buffer):
    """BlockSpec for a constant-index (resident) input; optionally single-buffered
    (its second pipeline buffer is never used since the index_map is constant)."""
    if single_buffer:
        return pl.BlockSpec(block_shape, index_map, pipeline_mode=pl.Buffered(1))
    return pl.BlockSpec(block_shape, index_map)


def projection_kernel(x_ref, w_ref, ft_ref):
    # (TM, Din) @ (Din, HDP) -> f32 MXU accumulation, stored lane-dense as bf16.
    ft_ref[...] = jnp.dot(x_ref[...], w_ref[...],
                          preferred_element_type=jnp.float32).astype(ft_ref.dtype)


def attention_kernel(a2_ref, a1_ref, adj_ref, ft_ref, out_ref, *attn_out,
                     negative_slope, write_attn):
    # logits[v, u] = a1[u] + a2[v]   (row = destination v, col = source u)
    logits = a2_ref[...] + a1_ref[...]                       # (TM,1)+(1,N) -> (TM,N)
    # LeakyReLU (0 < slope < 1): max(x, slope * x).
    logits = jnp.maximum(logits, negative_slope * logits)

    # Masked edge softmax over incoming edges of each destination row.  The int8
    # adjacency is compared directly (no int8->f32 unpack); exp(NEG_INF - m)
    # underflows to exactly 0 so a single select suffices.  Invariant: every
    # destination has at least one in-edge (self-loops), so m is finite, denom > 0.
    mask = adj_ref[...] > 0
    masked = jnp.where(mask, logits, NEG_INF)
    m = jnp.max(masked, axis=-1, keepdims=True)
    e = jnp.exp(masked - m)
    denom = jnp.sum(e, axis=-1, keepdims=True)
    attn = e * pl.reciprocal(denom, approx=True)             # EUP slot, ~free after exp

    # Message passing on the bf16-native MXU: ret[v] = sum_u attn[v, u] * ft[u]
    # (head-0 attention broadcast over all heads/dims, matching the module).
    out_ref[...] = jnp.dot(attn.astype(ft_ref.dtype), ft_ref[...],
                           preferred_element_type=jnp.float32)
    if write_attn:
        attn_out[0][...] = attn.astype(attn_out[0].dtype)


def graph_attention_forward(x, w, attn_l, attn_r, adj, *, num_heads, out_dim,
                            negative_slope=0.2, return_attn=True,
                            attn_dtype=jnp.bfloat16, ft_dtype=jnp.bfloat16,
                            single_buffer_residents=True, min_grid_steps=4):
    N, Din = x.shape
    HD = w.shape[1]
    assert HD == num_heads * out_dim
    f32 = jnp.float32
    x_f32 = x.astype(f32)
    w_f32 = w.astype(f32)

    # Lane-dense padded feature width (multiple of 128 lanes).
    HDP = max(LANE, _round_up(HD, LANE))
    w_pad = jnp.zeros((Din, HDP), f32).at[:, :HD].set(w_f32)

    # Hoisted per-node attention logits (head 0), kept in f32:
    #   a1 = x @ (W[:, :D] @ attn_l),  a2 = x @ (W[:, :D] @ attn_r)
    # One tiny (N, Din) x (Din, 2) matmul in the wrapper replaces the per-grid-step
    # M=1 contraction of the full resident ft inside the kernel.
    proj_lr = w_f32[:, :out_dim] @ jnp.stack(
        [attn_l.reshape(out_dim).astype(f32),
         attn_r.reshape(out_dim).astype(f32)], axis=1)        # (Din, 2)
    a12 = x_f32 @ proj_lr                                     # (N, 2)
    a1_row = a12[:, 0].reshape(1, N)                          # source term, row layout
    a2_col = a12[:, 1:2]                                      # destination term, (N, 1)

    # Adjacency as int8 (bool / integer adjacency accepted as-is; 4x less HBM than f32).
    if jnp.issubdtype(adj.dtype, jnp.floating):
        adj_i8 = (adj > 0).astype(jnp.int8)
    else:
        adj_i8 = adj.astype(jnp.int8)
    # TODO(synk): pack the adjacency to 1 bit/edge (uint8 bitmask + shift/and in-kernel)
    # if profiling at large N shows the adjacency DMA as the exposed stream.

    # Generation-aware VMEM sizing: v7x 64 MiB -> 48 MiB scoped, v5e/v6e 128 -> 96 MiB,
    # with extra headroom below that for compiler scratch when picking row tiles.
    vmem_cap = _vmem_capacity_bytes()
    vmem_limit = (vmem_cap * 3) // 4
    tile_budget = (vmem_limit * 4) // 5

    compiler_params = pltpu.CompilerParams(
        dimension_semantics=("parallel",),      # independent row blocks -> megacore
        vmem_limit_bytes=vmem_limit)

    ft_itemsize = jnp.dtype(ft_dtype).itemsize
    attn_itemsize = jnp.dtype(attn_dtype).itemsize

    def run(single_buffer):
        resident_factor = 1 if single_buffer else 2

        # ------------- Kernel 1: projection ft = bf16(x @ w_pad) -------------
        w_bytes = resident_factor * Din * HDP * 4
        per_row_p = 2 * Din * 4 + 2 * HDP * ft_itemsize
        tm_p = _pick_row_tile(N, per_row_p, max(tile_budget - w_bytes, 1 << 20),
                              min_tile=8, min_grid_steps=min_grid_steps)
        ft = pl.pallas_call(
            projection_kernel,
            out_shape=jax.ShapeDtypeStruct((N, HDP), ft_dtype),
            grid=(N // tm_p,),
            in_specs=[
                pl.BlockSpec((tm_p, Din), lambda i: (i, 0)),
                _resident_spec((Din, HDP), lambda i: (0, 0), single_buffer),
            ],
            out_specs=pl.BlockSpec((tm_p, HDP), lambda i: (i, 0)),
            compiler_params=compiler_params,
        )(x_f32, w_pad)

        # ------------- Kernel 2: masked softmax attention + aggregation -------------
        resident_bytes = resident_factor * N * HDP * ft_itemsize + 2 * N * 4
        per_row = (2 * N                                    # int8 adjacency block
                   + 2 * 4                                  # a2 block
                   + 2 * HDP * 4                            # f32 aggregation output
                   + (2 * N * attn_itemsize if return_attn else 0))
        tm = _pick_row_tile(N, per_row, max(tile_budget - resident_bytes, 1 << 20),
                            min_tile=32, min_grid_steps=min_grid_steps)

        kernel = functools.partial(attention_kernel,
                                   negative_slope=negative_slope,
                                   write_attn=return_attn)
        out_shapes = [jax.ShapeDtypeStruct((N, HDP), jnp.float32)]
        out_specs = [pl.BlockSpec((tm, HDP), lambda i: (i, 0))]
        if return_attn:
            out_shapes.append(jax.ShapeDtypeStruct((N, N), attn_dtype))
            out_specs.append(pl.BlockSpec((tm, N), lambda i: (i, 0)))

        results = pl.pallas_call(
            kernel,
            out_shape=tuple(out_shapes),
            grid=(N // tm,),
            in_specs=[
                pl.BlockSpec((tm, 1), lambda i: (i, 0)),                    # a2 (dst)
                pl.BlockSpec((1, N), lambda i: (0, 0)),                     # a1 (src) row
                pl.BlockSpec((tm, N), lambda i: (i, 0)),                    # int8 adjacency
                _resident_spec((N, HDP), lambda i: (0, 0), single_buffer),  # resident ft
            ],
            out_specs=tuple(out_specs),
            compiler_params=compiler_params,
        )(a2_col, a1_row, adj_i8, ft)
        return jax.block_until_ready(results)

    try:
        results = run(single_buffer_residents)
    except Exception:
        if not single_buffer_residents:
            raise
        # pipeline_mode=pl.Buffered(1) rejected by this jax version: fall back to the
        # default double-buffered residents (correctness unchanged, slightly more VMEM).
        results = run(False)

    ret = results[0][:, :HD].reshape(N, num_heads, out_dim)
    if return_attn:
        return ret, results[1]
    return ret


def reference_forward(x, w, attn_l, attn_r, adj, *, num_heads, out_dim,
                      negative_slope=0.2):
    N = x.shape[0]
    ft = (x @ w).reshape(N, num_heads, out_dim)
    a1 = jnp.sum(ft * attn_l[None], axis=-1)[:, 0]            # (N,) head 0, src
    a2 = jnp.sum(ft * attn_r[None], axis=-1)[:, 0]            # (N,) head 0, dst
    logits = a2[:, None] + a1[None, :]                        # (N, N) [dst, src]
    logits = jnp.where(logits >= 0, logits, negative_slope * logits)
    mask = adj.astype(bool)
    masked = jnp.where(mask, logits, NEG_INF)
    e = jnp.where(mask, jnp.exp(masked - masked.max(-1, keepdims=True)), 0.0)
    attn = e / e.sum(-1, keepdims=True)
    ret = jnp.einsum("vu,uhd->vhd", attn, ft)
    return ret, attn


if __name__ == "__main__":
    # Small deterministic problem, big enough that the attention grid has 4 row tiles
    # (N=512, tm=128) so per-block DMAs pipeline and both v7x cores get >=2 steps.
    N, in_dim, num_heads, out_dim = 512, 32, 2, 16
    negative_slope = 0.2

    key = jax.random.PRNGKey(0)
    kx, kw, kl, kr, kadj = jax.random.split(key, 5)

    x = jax.random.normal(kx, (N, in_dim), dtype=jnp.float32)

    # Xavier-normal-ish deterministic init (gain 1.414), matching parameter shapes:
    #   fc.weight: (num_heads*out_dim, in_dim) in torch -> stored transposed here.
    gain = 1.414
    std_w = gain * (2.0 / (in_dim + num_heads * out_dim)) ** 0.5
    w = std_w * jax.random.normal(kw, (in_dim, num_heads * out_dim), dtype=jnp.float32)
    std_a = gain * (2.0 / (1 + out_dim)) ** 0.5
    attn_l = std_a * jax.random.normal(kl, (1, out_dim), dtype=jnp.float32)
    attn_r = std_a * jax.random.normal(kr, (1, out_dim), dtype=jnp.float32)

    # Deterministic sparse-ish graph, built directly as a boolean adjacency (no N^2
    # float conversion), with self-loops so every destination has an incoming edge.
    adj = (jax.random.uniform(kadj, (N, N)) < 0.1) | jnp.eye(N, dtype=bool)
    assert bool(jnp.all(jnp.sum(adj, axis=-1) > 0)), "isolated destination row"

    ret, attn = graph_attention_forward(
        x, w, attn_l, attn_r, adj,
        num_heads=num_heads, out_dim=out_dim, negative_slope=negative_slope,
        return_attn=True)
    ret = jax.block_until_ready(ret)

    ret_ref, attn_ref = reference_forward(
        x, w, attn_l, attn_r, adj,
        num_heads=num_heads, out_dim=out_dim, negative_slope=negative_slope)

    assert ret.shape == (N, num_heads, out_dim) and ret.dtype == jnp.float32
    assert attn.shape == (N, N)
    # bf16 aggregation operands + bf16 attention output + EUP approx reciprocal
    # -> bf16-level tolerances against the f32 reference.
    assert jnp.allclose(ret, ret_ref, atol=5e-2, rtol=5e-2)
    assert jnp.allclose(attn.astype(jnp.float32), attn_ref, atol=1e-2, rtol=0)

    # TODO(synk): DGL's returned nonzero-edge index list and the l0 / dropout /
    # residual branches are not reproduced; with the defaults used here
    # (l0=0, feat_drop=0, attn_drop=0, residual=False, skip=0) they are no-ops.
    print("KERNEL_OK")
</pallas_src>

<mosaic_0001>
module attributes {stable_mosaic.version = 11 : i64} {
  func.func @projection_kernel(%arg0: i32, %arg1: memref<128x32xf32, #tpu.memory_space<vmem>>, %arg2: memref<32x128xf32, #tpu.memory_space<vmem>>, %arg3: memref<128x128xbf16, #tpu.memory_space<vmem>>) attributes {dimension_semantics = [#tpu.dimension_semantics<parallel>], iteration_bounds = array<i64: 4>, scalar_prefetch = 0 : i64, scratch_operands = 0 : i64, tpu.core_type = #tpu.core_type<tc>, window_params = [{transform_indices = @transform_0, window_bounds = array<i64: 128, 32>}, {pipeline_mode = #tpu.pipeline_mode<synchronous>, transform_indices = @transform_1, window_bounds = array<i64: 32, 128>}, {transform_indices = @transform_2, window_bounds = array<i64: 128, 128>}]} {
    %c0 = arith.constant 0 : index
    %c0_0 = arith.constant 0 : index
    %0 = vector.load %arg1[%c0, %c0_0] : memref<128x32xf32, #tpu.memory_space<vmem>>, vector<128x32xf32>
    %c0_1 = arith.constant 0 : index
    %c0_2 = arith.constant 0 : index
    %1 = vector.load %arg2[%c0_1, %c0_2] : memref<32x128xf32, #tpu.memory_space<vmem>>, vector<32x128xf32>
    %cst = arith.constant dense<0.000000e+00> : vector<128x128xf32>
    %2 = tpu.matmul %0, %1, %cst {dimension_numbers = #tpu.dot_dimension_numbers<[1], [0], [0], [1], [0, 0, 1, 1], [], []>} : vector<128x32xf32>, vector<32x128xf32>, vector<128x128xf32> -> vector<128x128xf32>
    %3 = arith.truncf %2 : vector<128x128xf32> to vector<128x128xbf16>
    %c0_3 = arith.constant 0 : index
    %c0_4 = arith.constant 0 : index
    %4 = vector.load %arg3[%c0_3, %c0_4] : memref<128x128xbf16, #tpu.memory_space<vmem>>, vector<128x128xbf16>
    tpu.vector_store %arg3[%c0_3, %c0_4], %3 {strides = array<i32>} : memref<128x128xbf16, #tpu.memory_space<vmem>>, vector<128x128xbf16>,
    return
  }
  func.func @transform_0(%arg0: i32) -> (i32, i32) {
    %c0_i32 = arith.constant 0 : i32
    %c0_i32_0 = arith.constant 0 : i32
    return %arg0, %c0_i32 : i32, i32
  }
  func.func @transform_1(%arg0: i32) -> (i32, i32) {
    %c0_i32 = arith.constant 0 : i32
    %c0_i32_0 = arith.constant 0 : i32
    %c0_i32_1 = arith.constant 0 : i32
    return %c0_i32, %c0_i32_0 : i32, i32
  }
  func.func @transform_2(%arg0: i32) -> (i32, i32) {
    %c0_i32 = arith.constant 0 : i32
    %c0_i32_0 = arith.constant 0 : i32
    return %arg0, %c0_i32 : i32, i32
  }
}

module attributes {stable_mosaic.version = 11 : i64} {
  func.func @projection_kernel(%arg0: i32, %arg1: memref<128x32xf32, #tpu.memory_space<vmem>>, %arg2: memref<32x128xf32, #tpu.memory_space<vmem>>, %arg3: memref<128x128xbf16, #tpu.memory_space<vmem>>) attributes {dimension_semantics = [#tpu.dimension_semantics<parallel>], iteration_bounds = array<i64: 4>, scalar_prefetch = 0 : i64, scratch_operands = 0 : i64, tpu.core_type = #tpu.core_type<tc>, window_params = [{transform_indices = @transform_0, window_bounds = array<i64: 128, 32>}, {pipeline_mode = #tpu.pipeline_mode<synchronous>, transform_indices = @transform_1, window_bounds = array<i64: 32, 128>}, {transform_indices = @transform_2, window_bounds = array<i64: 128, 128>}]} {
    %c0 = arith.constant 0 : index
    %c0_0 = arith.constant 0 : index
    %0 = vector.load %arg1[%c0, %c0_0] : memref<128x32xf32, #tpu.memory_space<vmem>>, vector<128x32xf32>
    %c0_1 = arith.constant 0 : index
    %c0_2 = arith.constant 0 : index
    %1 = vector.load %arg2[%c0_1, %c0_2] : memref<32x128xf32, #tpu.memory_space<vmem>>, vector<32x128xf32>
    %cst = arith.constant dense<0.000000e+00> : vector<128x128xf32>
    %2 = tpu.matmul %0, %1, %cst {dimension_numbers = #tpu.dot_dimension_numbers<[1], [0], [0], [1], [0, 0, 1, 1], [], []>} : vector<128x32xf32>, vector<32x128xf32>, vector<128x128xf32> -> vector<128x128xf32>
    %3 = arith.truncf %2 : vector<128x128xf32> to vector<128x128xbf16>
    %c0_3 = arith.constant 0 : index
    %c0_4 = arith.constant 0 : index
    %4 = vector.load %arg3[%c0_3, %c0_4] : memref<128x128xbf16, #tpu.memory_space<vmem>>, vector<128x128xbf16>
    tpu.vector_store %arg3[%c0_3, %c0_4], %3 {strides = array<i32>} : memref<128x128xbf16, #tpu.memory_space<vmem>>, vector<128x128xbf16>,
    return
  }
  func.func @transform_0(%arg0: i32) -> (i32, i32) {
    %c0_i32 = arith.constant 0 : i32
    %c0_i32_0 = arith.constant 0 : i32
    return %arg0, %c0_i32 : i32, i32
  }
  func.func @transform_1(%arg0: i32) -> (i32, i32) {
    %c0_i32 = arith.constant 0 : i32
    %c0_i32_0 = arith.constant 0 : i32
    %c0_i32_1 = arith.constant 0 : i32
    return %c0_i32, %c0_i32_0 : i32, i32
  }
  func.func @transform_2(%arg0: i32) -> (i32, i32) {
    %c0_i32 = arith.constant 0 : i32
    %c0_i32_0 = arith.constant 0 : i32
    return %arg0, %c0_i32 : i32, i32
  }
}

</mosaic_0001>

<bundles_post_ra>
// kernel: tpu_custom_call.1
= control target key start
LH: loop header
LB: loop body
LE: loop exit
PB: predicated region body
PF: predicated region fallthrough
CT: control target
= control target key end

     0   :  { %7 = vsyncpa [#allocation3], 0  ;;  %s962_s0 = inlined_call_operand.vmem [shape: f32[512,32], index: 0, kind: input, shape index: {}]   ;;  %s963_s1 = inlined_call_operand.vmem [shape: f32[32,128], index: 1, kind: input, shape index: {}]   ;;  %s964_s2 = inlined_call_operand.hbm [shape: bf16[512,128], index: 2, kind: output, shape index: {}]  }
   0x1   :  { %9 = vsyncpa [#allocation3 + $0x1], 0  ;;  %s810_s9 = smov 0   ;;  %s812_s10 = smov 0  }
   0x2   :  { %s814_s11 = smov 0   ;;  %s816_s12 = smov 0  }
   0x3 LB: > { %s831_s13 = sadd.s32 4294967295, %s790_s12   ;;  %s515_s14 = sadd.s32 4294967294, %s790_s12   ;;  %s790_s12 = sphi %s816_s12, %s970_s12   ;;  %s786_s11 = sphi %s814_s11, %s969_s11   ;;  %s782_s10 = sphi %s812_s10, %s968_s10   ;;  %s778_s9 = sphi %s810_s9, %s967_s9  }
   0x4   : > { %s835_s15 = sadd.s32 1, %s790_s12   ;;  %s69_s16 = sadd.s32 1, %s786_s11 }
   0x5   : > { %s66_s17 = ssub.s32 %s790_s12, %s835_s15  ;;  %p79_p0 = scmp.ne.s32.totalorder %s786_s11, %s782_s10 }
   0x6   : > { %p67_p1 = scmp.eq.s32.totalorder %s66_s17, 0  ;;  %p80_p2 = scmp.eq.s32.totalorder %s831_s13, 3 }
   0x7   : > { %p85_p3 = scmp.ne.s32.totalorder %s782_s10, %s778_s9  ;;  %p86_p4 = scmp.eq.s32.totalorder %s515_s14, 3 }
   0x8   : > { %s846_s18 = scalar_select %p67_p1, %s786_s11, %s69_s16  }
   0x9   : > { %p848_p5 = por %p80_p2, %p79_p0  ;;  %p852_p6 = por %p86_p4, %p85_p3 }
   0xa   : > { %p518_p7 = scmp.ge.s32.totalorder %s790_s12, 1  ;;  %p116_p8 = scmp.lt.s32.totalorder %s790_s12, 5 }
   0xc   : > { %p117_p9 = pnand %p518_p7, %p116_p8 }
   0xd   : > { %v161_v0 = vld [vmem:[%s963_s1] sm:$0xff] (!%p117_p9)  ;;  %v162_v1 = vld [vmem:[%s963_s1 + $0x8] sm:$0xff] (!%p117_p9)  ;;  %v163_v2 = vld [vmem:[%s963_s1 + $0x10] sm:$0xff] (!%p117_p9)  ;;  %s520_s27 = sshll.u32 (!%p117_p9), %s831_s13, 4  ;;  %vm165_vm0 = vcmask (!%p117_p9), 261120   ;;  %s135_s6 = sand.u32 (!%p117_p9), 1, %s782_s10  }
   0xe   : > { %120 = sbr.rel (%p117_p9) target bundleno = 269 (0x10d), region = 28  ;;  %v675_v3 = vpack.c.bf16 (!%p117_p9), %v162_v1, %v161_v0  ;;  %v164_v4 = vld [vmem:[%s963_s1 + $0x18] sm:$0xff] (!%p117_p9)  ;;  %p139_p10 = scmp.lt.s32.totalorder (!%p117_p9), %s520_s27, 63 }
   0xf   : > { %v679_v5 = vpack.c.bf16 (!%p117_p9), %v164_v4, %v163_v2  ;;  %s519_s7 = sshll.u32 (!%p117_p9), %s135_s6, 6  ;;  %s575_s14 = sshll.u32 (!%p117_p9), %s831_s13, 10 }
  0x10   : > { %676 = vmatprep.subr.bf16.mxu0 (!%p117_p9), %v675_v3  ;;  %683 = vmatprep.subr.bf16.mxu1 (!%p117_p9), %v675_v3  ;;  %s137_s8 = scalar_lea.vmem (!%p117_p9), [#allocation2], %s519_s7  ;;  %s915_s22 = scalar_lea.hbm (!%p117_p9), %s964_s2, %s575_s14 }
  0x11   : > { %678 = vmatpush3.bf16.msra.mxu0 (!%p117_p9), %v675_v3  ;;  %685 = vmatpush3.bf16.msra.mxu1 (!%p117_p9), %v675_v3  ;;  %s453_s16 = sshll.u32 (!%p117_p9), %s137_s8, 4  ;;  %s921_s13 = scalar_lea.sflag (!%p117_p9), [#allocation3], %s135_s6  ;;  %s917_s16 = int_to_ptr.vmem [resolvable:$true] %s453_s16 }
  0x12   : > { %680 = vmatprep.subr.bf16.mxu0 (!%p117_p9), %v679_v5  ;;  %684 = vmatprep.subr.bf16.mxu1 (!%p117_p9), %v679_v5  ;;  %s728_s23 = scalar_lea.vmem (!%p117_p9), %s917_s16, 1024  ;;  %s792_s24 = smov (!%p117_p9), [#allocation2]  }
  0x13   : > { %p729_p11 = scmp.ne.s32.totalorder (!%p117_p9), %s917_s16, %s728_s23  ;;  %s732_s25 = sshll.u32 (!%p117_p9), %s792_s24, 4  ;;  %s733_s25 = int_to_ptr.vmem [resolvable:$false] %s732_s25 }
  0x14   : > { %s734_s26 = scalar_lea.vmem (!%p117_p9), %s733_s25, 2048  ;;  %p735_p0 = scmp.lt.s32.totalorder (!%p117_p9), %s917_s16, %s733_s25 }
  0x15   : > { %s972_s27 = smov (!%p139_p10, %s520_s27), 63  ;;  %682 = vmatpush3.bf16.msra.mxu0 %v679_v5  ;;  %686 = vmatpush3.bf16.msra.mxu1 %v679_v5  ;;  %p730_p12 = pnand %p729_p11, %p848_p5 }
  0x16   : > { %s521_s30 = sshll.u32 %s972_s27, 3  ;;  %p736_p1 = scmp.lt.s32.totalorder %s734_s26, %s728_s23 }
  0x17   : > { %s874_s5 = scalar_lea.vmem %s962_s0, %s521_s30  ;;  %p731_p13 = pneg %p730_p12 }
  0x18   : > { %v145_v6 = vld [vmem:[%s874_s5] sm:$0xff]  ;;  %v146_v8 = vld [vmem:[%s874_s5 + $0x8] sm:$0xff]  ;;  %v147_v10 = vld [vmem:[%s874_s5 + $0x10] sm:$0xff]  ;;  %p737_p2 = por %p736_p1, %p735_p0 }
  0x19   : > { %v153_v7 = vld [vmem:[%s874_s5 + $0x40] sm:$0xff]  ;;  %v154_v9 = vld [vmem:[%s874_s5 + $0x48] sm:$0xff]  ;;  %651 = vmatprep.mubr.msk.f32.mxu0 %vm165_vm0, %v145_v6  ;;  %v155_v11 = vld [vmem:[%s874_s5 + $0x50] sm:$0xff] }
  0x1a   : > { %663 = vmatprep.mubr.msk.f32.mxu1 %vm165_vm0, %v153_v7  ;;  %652 = vmatmul.mubr.msk.f32.vlgmr.msra.gmra.mrb[0].mxu0 %vm165_vm0, %v146_v8  ;;  %v148_v12 = vld [vmem:[%s874_s5 + $0x18] sm:$0xff]  ;;  %v149_v14 = vld [vmem:[%s874_s5 + $0x20] sm:$0xff]  ;;  %v150_v16 = vld [vmem:[%s874_s5 + $0x28] sm:$0xff]  ;;  %p738_p3 = pnand %p737_p2, %p731_p13 }
  0x1b   : > { %664 = vmatmul.mubr.msk.f32.vlgmr.msra.gmra.mrb[0].mxu1 %vm165_vm0, %v154_v9  ;;  %654 = vmatprep.mubr.msk.f32.mxu0 %vm165_vm0, %v147_v10  ;;  %v156_v13 = vld [vmem:[%s874_s5 + $0x58] sm:$0xff]  ;;  %v157_v15 = vld [vmem:[%s874_s5 + $0x60] sm:$0xff]  ;;  %v158_v17 = vld [vmem:[%s874_s5 + $0x68] sm:$0xff] }
  0x1c   : > { %666 = vmatprep.mubr.msk.f32.mxu1 %vm165_vm0, %v155_v11  ;;  %v151_v18 = vld [vmem:[%s874_s5 + $0x30] sm:$0xff]  ;;  %v152_v20 = vld [vmem:[%s874_s5 + $0x38] sm:$0xff] }
  0x1d   : > { %v159_v19 = vld [vmem:[%s874_s5 + $0x70] sm:$0xff]  ;;  %v160_v21 = vld [vmem:[%s874_s5 + $0x78] sm:$0xff] }
  0x1e   : > { %655 = vmatmul.mubr.msk.f32.gmra.mrb[2].mxu0 %vm165_vm0, %v148_v12 }
  0x1f   : > { %667 = vmatmul.mubr.msk.f32.gmra.mrb[2].mxu1 %vm165_vm0, %v156_v13  ;;  %657 = vmatprep.mubr.msk.f32.mxu0 %vm165_vm0, %v149_v14 }
  0x20   : > { %669 = vmatprep.mubr.msk.f32.mxu1 %vm165_vm0, %v157_v15 }
  0x22   : > { %658 = vmatmul.mubr.msk.f32.gmra.mrb[4].mxu0 %vm165_vm0, %v150_v16 }
  0x23   : > { %670 = vmatmul.mubr.msk.f32.gmra.mrb[4].mxu1 %vm165_vm0, %v158_v17  ;;  %660 = vmatprep.mubr.msk.f32.mxu0 %vm165_vm0, %v151_v18 }
  0x24   : > { %672 = vmatprep.mubr.msk.f32.mxu1 %vm165_vm0, %v159_v19 }
  0x26   : > { %661 = vmatmul.mubr.msk.f32.gmra.mrb[6].mxu0 %vm165_vm0, %v152_v20 }
  0x27   : > { %673 = vmatmul.mubr.msk.f32.gmra.mrb[6].mxu1 %vm165_vm0, %v160_v21 }
  0xed   : > { %v653_v22 = vpop.f32.mrb[0].mxu0 }
  0xee   : > { %v665_v23 = vpop.f32.mrb[0].mxu1  ;;  %v280_v24 = vpop.f32.mrb[1].mxu0 }
  0xef   : > { %v320_v25 = vpop.f32.mrb[1].mxu1  ;;  %v579_v26 = vpack.c.bf16 %v653_v22, %v280_v24 }
  0xf0   : > { %v599_v27 = vpack.c.bf16 %v665_v23, %v320_v25 }
  0xf1   : > { %580 = vst [vmem:[%s137_s8] sm:$0xff] %v579_v26   ;;  %v656_v28 = vpop.f32.mrb[2].mxu0 }
  0xf2   : > { %619 = vst [vmem:[%s137_s8 + $0x20] sm:$0xff] %v599_v27   ;;  %v668_v29 = vpop.f32.mrb[2].mxu1  ;;  %v290_v30 = vpop.f32.mrb[3].mxu0 }
  0xf3   : > { %v330_v31 = vpop.f32.mrb[3].mxu1  ;;  %v584_v32 = vpack.c.bf16 %v656_v28, %v290_v30 }
  0xf4   : > { %v604_v33 = vpack.c.bf16 %v668_v29, %v330_v31 }
  0xf5   : > { %616 = vst [vmem:[%s137_s8 + $0x8] sm:$0xff] %v584_v32   ;;  %v659_v34 = vpop.f32.mrb[4].mxu0 }
  0xf6   : > { %620 = vst [vmem:[%s137_s8 + $0x28] sm:$0xff] %v604_v33   ;;  %v671_v35 = vpop.f32.mrb[4].mxu1  ;;  %v300_v36 = vpop.f32.mrb[5].mxu0 }
  0xf7   : > { %v340_v37 = vpop.f32.mrb[5].mxu1  ;;  %v589_v38 = vpack.c.bf16 %v659_v34, %v300_v36 }
  0xf8   : > { %v609_v39 = vpack.c.bf16 %v671_v35, %v340_v37 }
  0xf9   : > { %617 = vst [vmem:[%s137_s8 + $0x10] sm:$0xff] %v589_v38   ;;  %v662_v40 = vpop.f32.mrb[6].mxu0 }
  0xfa   : > { %621 = vst [vmem:[%s137_s8 + $0x30] sm:$0xff] %v609_v39   ;;  %v674_v41 = vpop.f32.mrb[6].mxu1  ;;  %v310_v42 = vpop.f32.mrb[7].mxu0 }
  0xfb   : > { %v350_v43 = vpop.f32.mrb[7].mxu1  ;;  %v594_v44 = vpack.c.bf16 %v662_v40, %v310_v42 }
  0xfc   : > { %v614_v45 = vpack.c.bf16 %v674_v41, %v350_v43 }
  0xfd   : > { %618 = vst [vmem:[%s137_s8 + $0x18] sm:$0xff] %v594_v44  }
  0xfe   : > { %622 = vst [vmem:[%s137_s8 + $0x38] sm:$0xff] %v614_v45  }
  0xff   : > { %741 = shalt.err (!%p738_p3)
}
 0x100   : > { %s742_s27 = scalar_lea.hbm %s915_s22, 1024  ;;  %s746_s30 = scalar_lea.hbm %s964_s2, 4096 }
 0x101   : > { %p743_p4 = scmp.ne.s32.totalorder %s915_s22, %s742_s27  ;;  %p747_p9 = scmp.lt.u32.totalorder %s915_s22, %s964_s2 }
 0x102   : > { %p748_p10 = scmp.lt.u32.totalorder %s746_s30, %s742_s27  ;;  %p750_p12 = scmp.lt.u32.totalorder %s742_s27, %s915_s22 }
 0x103   : > { %p744_p7 = pnand %p743_p4, %p848_p5 }
 0x104   : > { %p749_p11 = por %p748_p10, %p747_p9 }
 0x105   : > { %p745_p8 = pneg %p744_p7 }
 0x106   : > { %p751_p13 = por %p750_p12, %p749_p11 }
 0x108   : > { %p752_p0 = pnand %p751_p13, %p745_p8 }
 0x10a   : > { %755 = shalt.err (!%p752_p0)
}
 0x10b   : > { %s793_s5 = smov 64   ;;  %s794_s6 = smov 4  }
 0x10c   : > { %687 = dma.vmem_to_hbm [thread:$0]  (%p848_p5), %s917_s16, 1024, %s915_s22, %s921_s13, %s793_s5, %s793_s5, %s794_s6  }
 0x10d PF: > { %p693_p1 = scmp.ge.s32.totalorder %s790_s12, 2  ;;  %s468_s7 = sand.u32 1, %s778_s9  }
 0x10e   : > { %s469_s8 = scalar_lea.sflag [#allocation3], %s468_s7 }
 0x10f   : > { %p690_p2 = pnand %p693_p1, %p852_p6 }
 0x111   : > { %773 = dma.done.wait (!%p690_p2), %s469_s8, 1024  }
 0x112   : > { %775 = vsyncadd (!%p690_p2), %s469_s8, 4294966272  ;;  %p12_p3 = scmp.ge.s32.totalorder %s835_s15, 6   ;;  %s967_s9 = smov %s782_s10 }
 0x113   : > { %s968_s10 = smov %s786_s11  ;;  %s969_s11 = smov %s846_s18 }
 0x114   : > { %s970_s12 = smov %s835_s15  ;;  %14 = sbr.rel (!%p12_p3) target bundleno = 3 (0x3), region = 63 }
 0x11b   :  { %474 = vsyncpa [#allocation3], 1 }
 0x11c   :  { %476 = vsyncpa [#allocation3 + $0x1], 1 }

// kernel: tpu_custom_call.1
= control target key start
LH: loop header
LB: loop body
LE: loop exit
PB: predicated region body
PF: predicated region fallthrough
CT: control target
= control target key end

     0   :  { %7 = vsyncpa [#allocation3], 0  ;;  %s962_s0 = inlined_call_operand.vmem [shape: f32[512,32], index: 0, kind: input, shape index: {}]   ;;  %s963_s1 = inlined_call_operand.vmem [shape: f32[32,128], index: 1, kind: input, shape index: {}]   ;;  %s964_s2 = inlined_call_operand.hbm [shape: bf16[512,128], index: 2, kind: output, shape index: {}]  }
   0x1   :  { %9 = vsyncpa [#allocation3 + $0x1], 0  ;;  %s810_s9 = smov 0   ;;  %s812_s10 = smov 0  }
   0x2   :  { %s814_s11 = smov 0   ;;  %s816_s12 = smov 0  }
   0x3 LB: > { %s831_s13 = sadd.s32 4294967295, %s790_s12   ;;  %s515_s14 = sadd.s32 4294967294, %s790_s12   ;;  %s790_s12 = sphi %s816_s12, %s970_s12   ;;  %s786_s11 = sphi %s814_s11, %s969_s11   ;;  %s782_s10 = sphi %s812_s10, %s968_s10   ;;  %s778_s9 = sphi %s810_s9, %s967_s9  }
   0x4   : > { %s835_s15 = sadd.s32 1, %s790_s12   ;;  %s69_s16 = sadd.s32 1, %s786_s11 }
   0x5   : > { %s66_s17 = ssub.s32 %s790_s12, %s835_s15  ;;  %p79_p0 = scmp.ne.s32.totalorder %s786_s11, %s782_s10 }
   0x6   : > { %p67_p1 = scmp.eq.s32.totalorder %s66_s17, 0  ;;  %p80_p2 = scmp.eq.s32.totalorder %s831_s13, 3 }
   0x7   : > { %p85_p3 = scmp.ne.s32.totalorder %s782_s10, %s778_s9  ;;  %p86_p4 = scmp.eq.s32.totalorder %s515_s14, 3 }
   0x8   : > { %s846_s18 = scalar_select %p67_p1, %s786_s11, %s69_s16  }
   0x9   : > { %p848_p5 = por %p80_p2, %p79_p0  ;;  %p852_p6 = por %p86_p4, %p85_p3 }
   0xa   : > { %p518_p7 = scmp.ge.s32.totalorder %s790_s12, 1  ;;  %p116_p8 = scmp.lt.s32.totalorder %s790_s12, 5 }
   0xc   : > { %p117_p9 = pnand %p518_p7, %p116_p8 }
   0xd   : > { %v161_v0 = vld [vmem:[%s963_s1] sm:$0xff] (!%p117_p9)  ;;  %v162_v1 = vld [vmem:[%s963_s1 + $0x8] sm:$0xff] (!%p117_p9)  ;;  %v163_v2 = vld [vmem:[%s963_s1 + $0x10] sm:$0xff] (!%p117_p9)  ;;  %s520_s27 = sshll.u32 (!%p117_p9), %s831_s13, 4  ;;  %vm165_vm0 = vcmask (!%p117_p9), 261120   ;;  %s135_s6 = sand.u32 (!%p117_p9), 1, %s782_s10  }
   0xe   : > { %120 = sbr.rel (%p117_p9) target bundleno = 269 (0x10d), region = 28  ;;  %v675_v3 = vpack.c.bf16 (!%p117_p9), %v162_v1, %v161_v0  ;;  %v164_v4 = vld [vmem:[%s963_s1 + $0x18] sm:$0xff] (!%p117_p9)  ;;  %p139_p10 = scmp.lt.s32.totalorder (!%p117_p9), %s520_s27, 63 }
   0xf   : > { %v679_v5 = vpack.c.bf16 (!%p117_p9), %v164_v4, %v163_v2  ;;  %s519_s7 = sshll.u32 (!%p117_p9), %s135_s6, 6  ;;  %s575_s14 = sshll.u32 (!%p117_p9), %s831_s13, 10 }
  0x10   : > { %676 = vmatprep.subr.bf16.mxu0 (!%p117_p9), %v675_v3  ;;  %683 = vmatprep.subr.bf16.mxu1 (!%p117_p9), %v675_v3  ;;  %s137_s8 = scalar_lea.vmem (!%p117_p9), [#allocation2], %s519_s7  ;;  %s915_s22 = scalar_lea.hbm (!%p117_p9), %s964_s2, %s575_s14 }
  0x11   : > { %678 = vmatpush3.bf16.msra.mxu0 (!%p117_p9), %v675_v3  ;;  %685 = vmatpush3.bf16.msra.mxu1 (!%p117_p9), %v675_v3  ;;  %s453_s16 = sshll.u32 (!%p117_p9), %s137_s8, 4  ;;  %s921_s13 = scalar_lea.sflag (!%p117_p9), [#allocation3], %s135_s6  ;;  %s917_s16 = int_to_ptr.vmem [resolvable:$true] %s453_s16 }
  0x12   : > { %680 = vmatprep.subr.bf16.mxu0 (!%p117_p9), %v679_v5  ;;  %684 = vmatprep.subr.bf16.mxu1 (!%p117_p9), %v679_v5  ;;  %s728_s23 = scalar_lea.vmem (!%p117_p9), %s917_s16, 1024  ;;  %s792_s24 = smov (!%p117_p9), [#allocation2]  }
  0x13   : > { %p729_p11 = scmp.ne.s32.totalorder (!%p117_p9), %s917_s16, %s728_s23  ;;  %s732_s25 = sshll.u32 (!%p117_p9), %s792_s24, 4  ;;  %s733_s25 = int_to_ptr.vmem [resolvable:$false] %s732_s25 }
  0x14   : > { %s734_s26 = scalar_lea.vmem (!%p117_p9), %s733_s25, 2048  ;;  %p735_p0 = scmp.lt.s32.totalorder (!%p117_p9), %s917_s16, %s733_s25 }
  0x15   : > { %s972_s27 = smov (!%p139_p10, %s520_s27), 63  ;;  %682 = vmatpush3.bf16.msra.mxu0 %v679_v5  ;;  %686 = vmatpush3.bf16.msra.mxu1 %v679_v5  ;;  %p730_p12 = pnand %p729_p11, %p848_p5 }
  0x16   : > { %s521_s30 = sshll.u32 %s972_s27, 3  ;;  %p736_p1 = scmp.lt.s32.totalorder %s734_s26, %s728_s23 }
  0x17   : > { %s874_s5 = scalar_lea.vmem %s962_s0, %s521_s30  ;;  %p731_p13 = pneg %p730_p12 }
  0x18   : > { %v145_v6 = vld [vmem:[%s874_s5] sm:$0xff]  ;;  %v146_v8 = vld [vmem:[%s874_s5 + $0x8] sm:$0xff]  ;;  %v147_v10 = vld [vmem:[%s874_s5 + $0x10] sm:$0xff]  ;;  %p737_p2 = por %p736_p1, %p735_p0 }
  0x19   : > { %v153_v7 = vld [vmem:[%s874_s5 + $0x40] sm:$0xff]  ;;  %v154_v9 = vld [vmem:[%s874_s5 + $0x48] sm:$0xff]  ;;  %651 = vmatprep.mubr.msk.f32.mxu0 %vm165_vm0, %v145_v6  ;;  %v155_v11 = vld [vmem:[%s874_s5 + $0x50] sm:$0xff] }
  0x1a   : > { %663 = vmatprep.mubr.msk.f32.mxu1 %vm165_vm0, %v153_v7  ;;  %652 = vmatmul.mubr.msk.f32.vlgmr.msra.gmra.mrb[0].mxu0 %vm165_vm0, %v146_v8  ;;  %v148_v12 = vld [vmem:[%s874_s5 + $0x18] sm:$0xff]  ;;  %v149_v14 = vld [vmem:[%s874_s5 + $0x20] sm:$0xff]  ;;  %v150_v16 = vld [vmem:[%s874_s5 + $0x28] sm:$0xff]  ;;  %p738_p3 = pnand %p737_p2, %p731_p13 }
  0x1b   : > { %664 = vmatmul.mubr.msk.f32.vlgmr.msra.gmra.mrb[0].mxu1 %vm165_vm0, %v154_v9  ;;  %654 = vmatprep.mubr.msk.f32.mxu0 %vm165_vm0, %v147_v10  ;;  %v156_v13 = vld [vmem:[%s874_s5 + $0x58] sm:$0xff]  ;;  %v157_v15 = vld [vmem:[%s874_s5 + $0x60] sm:$0xff]  ;;  %v158_v17 = vld [vmem:[%s874_s5 + $0x68] sm:$0xff] }
  0x1c   : > { %666 = vmatprep.mubr.msk.f32.mxu1 %vm165_vm0, %v155_v11  ;;  %v151_v18 = vld [vmem:[%s874_s5 + $0x30] sm:$0xff]  ;;  %v152_v20 = vld [vmem:[%s874_s5 + $0x38] sm:$0xff] }
  0x1d   : > { %v159_v19 = vld [vmem:[%s874_s5 + $0x70] sm:$0xff]  ;;  %v160_v21 = vld [vmem:[%s874_s5 + $0x78] sm:$0xff] }
  0x1e   : > { %655 = vmatmul.mubr.msk.f32.gmra.mrb[2].mxu0 %vm165_vm0, %v148_v12 }
  0x1f   : > { %667 = vmatmul.mubr.msk.f32.gmra.mrb[2].mxu1 %vm165_vm0, %v156_v13  ;;  %657 = vmatprep.mubr.msk.f32.mxu0 %vm165_vm0, %v149_v14 }
  0x20   : > { %669 = vmatprep.mubr.msk.f32.mxu1 %vm165_vm0, %v157_v15 }
  0x22   : > { %658 = vmatmul.mubr.msk.f32.gmra.mrb[4].mxu0 %vm165_vm0, %v150_v16 }
  0x23   : > { %670 = vmatmul.mubr.msk.f32.gmra.mrb[4].mxu1 %vm165_vm0, %v158_v17  ;;  %660 = vmatprep.mubr.msk.f32.mxu0 %vm165_vm0, %v151_v18 }
  0x24   : > { %672 = vmatprep.mubr.msk.f32.mxu1 %vm165_vm0, %v159_v19 }
  0x26   : > { %661 = vmatmul.mubr.msk.f32.gmra.mrb[6].mxu0 %vm165_vm0, %v152_v20 }
  0x27   : > { %673 = vmatmul.mubr.msk.f32.gmra.mrb[6].mxu1 %vm165_vm0, %v160_v21 }
  0xed   : > { %v653_v22 = vpop.f32.mrb[0].mxu0 }
  0xee   : > { %v665_v23 = vpop.f32.mrb[0].mxu1  ;;  %v280_v24 = vpop.f32.mrb[1].mxu0 }
  0xef   : > { %v320_v25 = vpop.f32.mrb[1].mxu1  ;;  %v579_v26 = vpack.c.bf16 %v653_v22, %v280_v24 }
  0xf0   : > { %v599_v27 = vpack.c.bf16 %v665_v23, %v320_v25 }
  0xf1   : > { %580 = vst [vmem:[%s137_s8] sm:$0xff] %v579_v26   ;;  %v656_v28 = vpop.f32.mrb[2].mxu0 }
  0xf2   : > { %619 = vst [vmem:[%s137_s8 + $0x20] sm:$0xff] %v599_v27   ;;  %v668_v29 = vpop.f32.mrb[2].mxu1  ;;  %v290_v30 = vpop.f32.mrb[3].mxu0 }
  0xf3   : > { %v330_v31 = vpop.f32.mrb[3].mxu1  ;;  %v584_v32 = vpack.c.bf16 %v656_v28, %v290_v30 }
  0xf4   : > { %v604_v33 = vpack.c.bf16 %v668_v29, %v330_v31 }
  0xf5   : > { %616 = vst [vmem:[%s137_s8 + $0x8] sm:$0xff] %v584_v32   ;;  %v659_v34 = vpop.f32.mrb[4].mxu0 }
  0xf6   : > { %620 = vst [vmem:[%s137_s8 + $0x28] sm:$0xff] %v604_v33   ;;  %v671_v35 = vpop.f32.mrb[4].mxu1  ;;  %v300_v36 = vpop.f32.mrb[5].mxu0 }
  0xf7   : > { %v340_v37 = vpop.f32.mrb[5].mxu1  ;;  %v589_v38 = vpack.c.bf16 %v659_v34, %v300_v36 }
  0xf8   : > { %v609_v39 = vpack.c.bf16 %v671_v35, %v340_v37 }
  0xf9   : > { %617 = vst [vmem:[%s137_s8 + $0x10] sm:$0xff] %v589_v38   ;;  %v662_v40 = vpop.f32.mrb[6].mxu0 }
  0xfa   : > { %621 = vst [vmem:[%s137_s8 + $0x30] sm:$0xff] %v609_v39   ;;  %v674_v41 = vpop.f32.mrb[6].mxu1  ;;  %v310_v42 = vpop.f32.mrb[7].mxu0 }
  0xfb   : > { %v350_v43 = vpop.f32.mrb[7].mxu1  ;;  %v594_v44 = vpack.c.bf16 %v662_v40, %v310_v42 }
  0xfc   : > { %v614_v45 = vpack.c.bf16 %v674_v41, %v350_v43 }
  0xfd   : > { %618 = vst [vmem:[%s137_s8 + $0x18] sm:$0xff] %v594_v44  }
  0xfe   : > { %622 = vst [vmem:[%s137_s8 + $0x38] sm:$0xff] %v614_v45  }
  0xff   : > { %741 = shalt.err (!%p738_p3)
}
 0x100   : > { %s742_s27 = scalar_lea.hbm %s915_s22, 1024  ;;  %s746_s30 = scalar_lea.hbm %s964_s2, 4096 }
 0x101   : > { %p743_p4 = scmp.ne.s32.totalorder %s915_s22, %s742_s27  ;;  %p747_p9 = scmp.lt.u32.totalorder %s915_s22, %s964_s2 }
 0x102   : > { %p748_p10 = scmp.lt.u32.totalorder %s746_s30, %s742_s27  ;;  %p750_p12 = scmp.lt.u32.totalorder %s742_s27, %s915_s22 }
 0x103   : > { %p744_p7 = pnand %p743_p4, %p848_p5 }
 0x104   : > { %p749_p11 = por %p748_p10, %p747_p9 }
 0x105   : > { %p745_p8 = pneg %p744_p7 }
 0x106   : > { %p751_p13 = por %p750_p12, %p749_p11 }
 0x108   : > { %p752_p0 = pnand %p751_p13, %p745_p8 }
 0x10a   : > { %755 = shalt.err (!%p752_p0)
}
 0x10b   : > { %s793_s5 = smov 64   ;;  %s794_s6 = smov 4  }
 0x10c   : > { %687 = dma.vmem_to_hbm [thread:$0]  (%p848_p5), %s917_s16, 1024, %s915_s22, %s921_s13, %s793_s5, %s793_s5, %s794_s6  }
 0x10d PF: > { %p693_p1 = scmp.ge.s32.totalorder %s790_s12, 2  ;;  %s468_s7 = sand.u32 1, %s778_s9  }
 0x10e   : > { %s469_s8 = scalar_lea.sflag [#allocation3], %s468_s7 }
 0x10f   : > { %p690_p2 = pnand %p693_p1, %p852_p6 }
 0x111   : > { %773 = dma.done.wait (!%p690_p2), %s469_s8, 1024  }
 0x112   : > { %775 = vsyncadd (!%p690_p2), %s469_s8, 4294966272  ;;  %p12_p3 = scmp.ge.s32.totalorder %s835_s15, 6   ;;  %s967_s9 = smov %s782_s10 }
 0x113   : > { %s968_s10 = smov %s786_s11  ;;  %s969_s11 = smov %s846_s18 }
 0x114   : > { %s970_s12 = smov %s835_s15  ;;  %14 = sbr.rel (!%p12_p3) target bundleno = 3 (0x3), region = 63 }
 0x11b   :  { %474 = vsyncpa [#allocation3], 1 }
 0x11c   :  { %476 = vsyncpa [#allocation3 + $0x1], 1 }

</bundles_post_ra>
